<compile_context>
chip_gen: v6e
topology: v6e:2x2x1
jax: 0.10.0
libtpu: 0.0.40
codegen_flags: <defaults>
</compile_context>

<pallas_src>
import jax
import jax.numpy as jnp
from jax.experimental import pallas as pl
from jax.experimental.pallas import tpu as pltpu

_LANES = 128                 # TPU lane width
_MIN_PALLAS_ROWS = 256       # below this, a plain fused XLA matmul beats a custom call
_SINGLE_TILE_MAX_PACKED = 8192   # packed rows; <= this -> one resident VMEM tile (no grid)
_TILE_PACKED = 2048          # packed rows per grid step in the gridded path (multiple of 8)


def _packed_linear_kernel(x_ref, w_ref, b_ref, out_ref):
    # x:   (tB, F)  lane-packed rows (F = pack*E = 128 here)
    # w:   (F, F)   block-diagonal weight in (in, out) orientation
    # b:   (1, F)   bias tiled `pack` times
    # out: (tB, F)
    acc = jnp.dot(x_ref[...], w_ref[...], preferred_element_type=jnp.float32)
    out_ref[...] = (acc + b_ref[...]).astype(out_ref.dtype)


def prepare_decoder_params(weight, bias, embedding_size):
    """One-time weight prep, hoisted out of the forward path.

    weight: (E, K + 1 + E) in PyTorch nn.Linear (out, in) layout; bias: (E,).
    The first K+1 inputs of the linear are always zero in the original module,
    so only weight[:, K+1:] is live (bit-exact to drop the rest).

    Returns (w_emb_T, w_packed, b_packed, pack):
      w_emb_T : (E, E)           live weight slice, transposed to (in, out)
      w_packed: (pack*E, pack*E) block-diagonal with `pack` copies of w_emb_T
      b_packed: (1, pack*E)      bias tiled `pack` times
      pack    : rows packed per 128-lane row (1 if E does not divide 128)
    """
    E = embedding_size
    start = weight.shape[1] - E          # K + 1
    w_emb_T = weight[:, start:].T        # (E_in, E_out)

    pack = _LANES // E if (E <= _LANES and _LANES % E == 0) else 1
    if pack > 1:
        # Off-diagonal blocks are exact zeros, so each E-lane chunk of a packed
        # row only contracts with its own copy of the weight (bit-exact).
        eye = jnp.eye(pack, dtype=weight.dtype)
        w_packed = jnp.einsum("pq,io->piqo", eye, w_emb_T).reshape(pack * E, pack * E)
        b_packed = jnp.tile(bias.reshape(1, E), (1, pack))
    else:
        w_packed = w_emb_T
        b_packed = bias.reshape(1, E)
    return w_emb_T, w_packed, b_packed, pack


def _pallas_packed_linear(x, w_packed, b_packed, pack):
    """y[b] = x[b] @ W_emb.T + bias via the lane-packed block-diagonal matmul."""
    B, E = x.shape
    F = pack * E

    # Pad B to a multiple of `pack` so rows pack losslessly into 128 lanes via a
    # free reshape of contiguous rows; pad rows are sliced off at the end.
    Bp = ((B + pack - 1) // pack) * pack
    xp = x if Bp == B else jnp.pad(x, ((0, Bp - B), (0, 0)))
    rows = Bp // pack
    x_packed = xp.reshape(rows, F)

    itemsize = jnp.dtype(x.dtype).itemsize
    cost = pl.CostEstimate(
        flops=2 * rows * F * F,
        transcendentals=0,
        bytes_accessed=(2 * rows * F + F * F + F) * itemsize,
    )

    if rows <= _SINGLE_TILE_MAX_PACKED:
        # Whole problem is a few MiB at most: keep it as one resident VMEM tile,
        # no grid, no per-step pipeline overhead.
        y_packed = pl.pallas_call(
            _packed_linear_kernel,
            out_shape=jax.ShapeDtypeStruct((rows, F), x.dtype),
            in_specs=[
                pl.BlockSpec(memory_space=pltpu.MemorySpace.VMEM),
                pl.BlockSpec(memory_space=pltpu.MemorySpace.VMEM),
                pl.BlockSpec(memory_space=pltpu.MemorySpace.VMEM),
            ],
            out_specs=pl.BlockSpec(memory_space=pltpu.MemorySpace.VMEM),
            cost_estimate=cost,
        )(x_packed, w_packed, b_packed)
    else:
        # Large batch: 1-D "parallel" grid over packed rows; weight/bias stay
        # resident. Tiles are ~1 MiB each (f32, F=128), so the default scoped
        # VMEM limit is fine on v5e/v6e/v7x with 2-deep buffering.
        # NOTE: if rows % _TILE_PACKED != 0 the edge block computes on garbage
        # rows that are dropped on store - fine for this row-wise linear; do not
        # add a reduction over the batch axis inside the kernel.
        grid = (pl.cdiv(rows, _TILE_PACKED),)
        y_packed = pl.pallas_call(
            _packed_linear_kernel,
            out_shape=jax.ShapeDtypeStruct((rows, F), x.dtype),
            grid_spec=pltpu.PrefetchScalarGridSpec(
                num_scalar_prefetch=0,
                grid=grid,
                in_specs=[
                    pl.BlockSpec((_TILE_PACKED, F), lambda i: (i, 0)),
                    pl.BlockSpec((F, F), lambda i: (0, 0)),
                    pl.BlockSpec((1, F), lambda i: (0, 0)),
                ],
                out_specs=pl.BlockSpec((_TILE_PACKED, F), lambda i: (i, 0)),
            ),
            compiler_params=pltpu.CompilerParams(
                dimension_semantics=("parallel",),
            ),
            cost_estimate=cost,
        )(x_packed, w_packed, b_packed)

    y = y_packed.reshape(Bp, E)
    return y if Bp == B else y[:B]


def simple_decoder_forward(embedding, query_result, weight, bias, prepared=None):
    """Faithful port of SimpleDecoder.forward.

    query_result's contents are dead in the original module (its mean is
    overwritten by zeros before the linear), so only the None-check survives.
    """
    if query_result is None:
        return embedding

    E = embedding.shape[-1]
    if prepared is None:
        prepared = prepare_decoder_params(weight, bias, E)
    w_emb_T, w_packed, b_packed, pack = prepared

    B = embedding.shape[0]
    if B < _MIN_PALLAS_ROWS:
        # Tiny batch: one vreg of work; let XLA fuse a plain matmul instead of
        # paying the pallas_call custom-call boundary (per perf review).
        return embedding @ w_emb_T + bias

    return _pallas_packed_linear(embedding, w_packed, b_packed, pack)


if __name__ == "__main__":
    key_size = 32
    embedding_size = 32
    batch = 2
    n_neighbours = 8

    k0, k1, k2, k3, k4 = jax.random.split(jax.random.PRNGKey(0), 5)

    # Deterministic "parameter init" for nn.Linear(key_size + 1 + embedding_size, embedding_size)
    in_features = key_size + 1 + embedding_size
    bound = 1.0 / jnp.sqrt(in_features)
    weight = jax.random.uniform(
        k0, (embedding_size, in_features), jnp.float32, -bound, bound
    )
    bias = jax.random.uniform(k1, (embedding_size,), jnp.float32, -bound, bound)

    # Example inputs (small shapes, matching the module)
    embedding = jax.random.normal(k2, (batch, embedding_size), jnp.float32)
    query_result = {
        "embedding": jax.random.normal(
            k3, (batch, n_neighbours, key_size), jnp.float32
        ),
        "label": jax.random.randint(k4, (batch, n_neighbours), 0, 5).astype(
            jnp.float32
        ),
    }

    # One-time weight prep (hoisted out of the forward path).
    prepared = prepare_decoder_params(weight, bias, embedding_size)

    def ref_forward(emb):
        # Pure-JAX reference of the EXACT original PyTorch semantics (the dead
        # neighbours mean is overwritten by zeros before the linear).
        zeros = jnp.zeros((emb.shape[0], key_size + 1), jnp.float32)
        return jnp.concatenate((zeros, emb), axis=-1) @ weight.T + bias

    # 1) Tiny batch (B=2): fused-XLA fast path; also checks the None branch.
    out_small = jax.block_until_ready(
        simple_decoder_forward(embedding, query_result, weight, bias, prepared)
    )
    assert out_small.shape == (batch, embedding_size)
    assert jnp.allclose(out_small, ref_forward(embedding), atol=1e-5, rtol=1e-5)
    assert jnp.array_equal(
        simple_decoder_forward(embedding, None, weight, bias, prepared), embedding
    )

    # 2) Pallas lane-packed single-tile path (B not a multiple of 4 -> pad path).
    B1 = 514
    emb1 = jax.random.normal(jax.random.PRNGKey(1), (B1, embedding_size), jnp.float32)
    out1 = jax.block_until_ready(
        simple_decoder_forward(emb1, query_result, weight, bias, prepared)
    )
    assert out1.shape == (B1, embedding_size)
    assert jnp.allclose(out1, ref_forward(emb1), atol=1e-5, rtol=1e-5)

    # 3) Pallas gridded (megacore-parallel) path with an edge block.
    B2 = 40964  # -> 10241 packed rows = 5 full 2048-row tiles + 1-row edge block
    emb2 = jax.random.normal(jax.random.PRNGKey(2), (B2, embedding_size), jnp.float32)
    out2 = jax.block_until_ready(
        simple_decoder_forward(emb2, query_result, weight, bias, prepared)
    )
    assert out2.shape == (B2, embedding_size)
    assert jnp.allclose(out2, ref_forward(emb2), atol=1e-5, rtol=1e-5)

    print("KERNEL_OK")
</pallas_src>

<mosaic_0001>
module attributes {stable_mosaic.version = 11 : i64} {
  func.func @_packed_linear_kernel(%arg0: memref<129x128xf32, #tpu.memory_space<vmem>>, %arg1: memref<128x128xf32, #tpu.memory_space<vmem>>, %arg2: memref<1x128xf32, #tpu.memory_space<vmem>>, %arg3: memref<129x128xf32, #tpu.memory_space<vmem>>) attributes {dimension_semantics = [], scalar_prefetch = 0 : i64, scratch_operands = 0 : i64, tpu.core_type = #tpu.core_type<tc>} {
    %c0 = arith.constant 0 : index
    %c0_0 = arith.constant 0 : index
    %0 = vector.load %arg0[%c0, %c0_0] : memref<129x128xf32, #tpu.memory_space<vmem>>, vector<129x128xf32>
    %c0_1 = arith.constant 0 : index
    %c0_2 = arith.constant 0 : index
    %1 = vector.load %arg1[%c0_1, %c0_2] : memref<128x128xf32, #tpu.memory_space<vmem>>, vector<128x128xf32>
    %cst = arith.constant dense<0.000000e+00> : vector<129x128xf32>
    %2 = tpu.matmul %0, %1, %cst {dimension_numbers = #tpu.dot_dimension_numbers<[1], [0], [0], [1], [0, 0, 1, 1], [], []>} : vector<129x128xf32>, vector<128x128xf32>, vector<129x128xf32> -> vector<129x128xf32>
    %c0_3 = arith.constant 0 : index
    %c0_4 = arith.constant 0 : index
    %3 = vector.load %arg2[%c0_3, %c0_4] : memref<1x128xf32, #tpu.memory_space<vmem>>, vector<1x128xf32>
    %4 = vector.broadcast %3 : vector<1x128xf32> to vector<129x128xf32>
    %5 = arith.addf %2, %4 : vector<129x128xf32>
    %c0_5 = arith.constant 0 : index
    %c0_6 = arith.constant 0 : index
    %6 = vector.load %arg3[%c0_5, %c0_6] : memref<129x128xf32, #tpu.memory_space<vmem>>, vector<129x128xf32>
    tpu.vector_store %arg3[%c0_5, %c0_6], %5 {strides = array<i32>} : memref<129x128xf32, #tpu.memory_space<vmem>>, vector<129x128xf32>,
    return
  }
}

</mosaic_0001>

<bundles_post_ra>
// kernel: tpu_custom_call.1
= control target key start
LH: loop header
LB: loop body
LE: loop exit
PB: predicated region body
PF: predicated region fallthrough
CT: control target
= control target key end

     0   :  { %8 = vsyncpa [#allocation3], 0  ;;  %s623_s0 = inlined_call_operand.hbm [shape: f32[129,128], index: 0, kind: input, shape index: {}]   ;;  %s624_s1 = inlined_call_operand.hbm [shape: f32[128,128], index: 1, kind: input, shape index: {}]   ;;  %s625_s2 = inlined_call_operand.vmem [shape: f32[1,128], index: 2, kind: input, shape index: {}]   ;;  %s626_s3 = inlined_call_operand.hbm [shape: f32[129,128], index: 3, kind: output, shape index: {}]  }
   0x1   :  { %9 = vsyncpa [#allocation6], 0 }
   0x2   :  { %10 = vsyncpa [#allocation4], 0  ;;  %s490_s12 = smov [#allocation2]  }
   0x3   :  { %s16_s13 = sshll.u32 %s490_s12, 4  ;;  %s17_s13 = int_to_ptr.vmem [resolvable:$true] %s16_s13 }
   0x4   :  { %s432_s14 = scalar_lea.vmem %s17_s13, 2176  ;;  %p437_p1 = scmp.lt.s32.totalorder %s17_s13, %s17_s13 }
   0x5   :  { %p433_p0 = scmp.ne.s32.totalorder %s17_s13, %s432_s14  ;;  %p438_p2 = scmp.lt.s32.totalorder %s432_s14, %s432_s14 }
   0x7   :  { %p439_p3 = por %p438_p2, %p437_p1 }
   0x9   :  { %p440_p4 = pnand %p439_p3, %p433_p0 }
   0xb   :  { %443 = shalt.err (!%p440_p4)
}
   0xc   :  { %s491_s15 = smov 128   ;;  %s492_s16 = smov 8  }
   0xd   :  { %22 = dma.hbm_to_vmem [thread:$0]  %s623_s0, 2176, %s17_s13, [#allocation3], %s491_s15, %s491_s15, %s492_s16  }
   0xe   :  { %s493_s19 = smov [#allocation5]  }
   0xf   :  { %s28_s20 = sshll.u32 %s493_s19, 4  ;;  %s29_s20 = int_to_ptr.vmem [resolvable:$true] %s28_s20 }
  0x10   :  { %s452_s21 = scalar_lea.vmem %s29_s20, 2048  ;;  %p457_p6 = scmp.lt.s32.totalorder %s29_s20, %s29_s20 }
  0x11   :  { %p453_p5 = scmp.ne.s32.totalorder %s29_s20, %s452_s21  ;;  %p458_p7 = scmp.lt.s32.totalorder %s452_s21, %s452_s21 }
  0x13   :  { %p459_p8 = por %p458_p7, %p457_p6 }
  0x15   :  { %p460_p9 = pnand %p459_p8, %p453_p5 }
  0x17   :  { %463 = shalt.err (!%p460_p9)
}
  0x18   :  { %34 = dma.hbm_to_vmem [thread:$0]  %s624_s1, 2048, %s29_s20, [#allocation6], %s491_s15, %s491_s15, %s492_s16  }
  0x19   :  { %484 = dma.done.wait [#allocation3], 2176  }
  0x1a   :  { %485 = vsyncadd [#allocation3], 4294965120 }
  0x1b   :  { %486 = dma.done.wait [#allocation6], 2048  }
  0x1c   :  { %487 = vsyncadd [#allocation6], 4294965248  ;;  %v494_v0 = vmov 0.0   ;;  %vm495_vm0 = vmmov 0   ;;  %v75_v1 = vld [vmem:[#allocation5 + $0x78] sm:$0xff]  ;;  %v74_v2 = vld [vmem:[#allocation5 + $0x70] sm:$0xff] }
  0x1d   :  { %302 = vmatprep.subr.mxu0 %v494_v0  ;;  %385 = vmatprep.subr.mxu1 %v494_v0  ;;  %v73_v3 = vld [vmem:[#allocation5 + $0x68] sm:$0xff]  ;;  %v72_v4 = vld [vmem:[#allocation5 + $0x60] sm:$0xff]  ;;  %v71_v5 = vld [vmem:[#allocation5 + $0x58] sm:$0xff] }
  0x1e   :  { %334 = vmatprep.mubr.msk.f32.mxu0 %vm495_vm0, %v494_v0  ;;  %361 = vmatprep.mubr.msk.f32.mxu1 %vm495_vm0, %v494_v0  ;;  %v70_v6 = vld [vmem:[#allocation5 + $0x50] sm:$0xff]  ;;  %v69_v7 = vld [vmem:[#allocation5 + $0x48] sm:$0xff]  ;;  %v68_v8 = vld [vmem:[#allocation5 + $0x40] sm:$0xff] }
  0x1f   :  { %303 = vmatpush3.msra.mxu0 %v75_v1  ;;  %401 = vmatpush3.msra.mxu1 %v75_v1  ;;  %v67_v9 = vld [vmem:[#allocation5 + $0x38] sm:$0xff]  ;;  %v66_v10 = vld [vmem:[#allocation5 + $0x30] sm:$0xff]  ;;  %v65_v11 = vld [vmem:[#allocation5 + $0x28] sm:$0xff] }
  0x20   :  { %304 = vmatprep.subr.mxu0 %v494_v0  ;;  %386 = vmatprep.subr.mxu1 %v494_v0  ;;  %v64_v12 = vld [vmem:[#allocation5 + $0x20] sm:$0xff]  ;;  %v63_v13 = vld [vmem:[#allocation5 + $0x18] sm:$0xff]  ;;  %v62_v14 = vld [vmem:[#allocation5 + $0x10] sm:$0xff] }
  0x21   :  { %305 = vmatpush3.msra.mxu0 %v74_v2  ;;  %402 = vmatpush3.msra.mxu1 %v74_v2  ;;  %v61_v15 = vld [vmem:[#allocation5 + $0x8] sm:$0xff]  ;;  %v60_v16 = vld [vmem:[#allocation5] sm:$0xff]  ;;  %v43_v17 = vld [vmem:[#allocation2] sm:$0xff] }
  0x22   :  { %306 = vmatprep.subr.mxu0 %v494_v0  ;;  %387 = vmatprep.subr.mxu1 %v494_v0  ;;  %v52_v18 = vld [vmem:[#allocation2 + $0x48] sm:$0xff]  ;;  %v53_v20 = vld [vmem:[#allocation2 + $0x50] sm:$0xff]  ;;  %v54_v22 = vld [vmem:[#allocation2 + $0x58] sm:$0xff] }
  0x23   :  { %307 = vmatpush3.msra.mxu0 %v73_v3  ;;  %403 = vmatpush3.msra.mxu1 %v73_v3  ;;  %v44_v19 = vld [vmem:[#allocation2 + $0x8] sm:$0xff]  ;;  %v45_v21 = vld [vmem:[#allocation2 + $0x10] sm:$0xff]  ;;  %v46_v23 = vld [vmem:[#allocation2 + $0x18] sm:$0xff] }
  0x24   :  { %308 = vmatprep.subr.mxu0 %v494_v0  ;;  %388 = vmatprep.subr.mxu1 %v494_v0  ;;  %v55_v24 = vld [vmem:[#allocation2 + $0x60] sm:$0xff]  ;;  %v56_v26 = vld [vmem:[#allocation2 + $0x68] sm:$0xff]  ;;  %v57_v28 = vld [vmem:[#allocation2 + $0x70] sm:$0xff] }
  0x25   :  { %309 = vmatpush3.msra.mxu0 %v72_v4  ;;  %404 = vmatpush3.msra.mxu1 %v72_v4  ;;  %v47_v25 = vld [vmem:[#allocation2 + $0x20] sm:$0xff]  ;;  %v48_v27 = vld [vmem:[#allocation2 + $0x28] sm:$0xff]  ;;  %v49_v29 = vld [vmem:[#allocation2 + $0x30] sm:$0xff] }
  0x26   :  { %310 = vmatprep.subr.mxu0 %v494_v0  ;;  %389 = vmatprep.subr.mxu1 %v494_v0  ;;  %v58_v30 = vld [vmem:[#allocation2 + $0x78] sm:$0xff]  ;;  %v59_v32 = vld [vmem:[#allocation2 + $0x80] sm:$0x1] }
  0x27   :  { %311 = vmatpush3.msra.mxu0 %v71_v5  ;;  %405 = vmatpush3.msra.mxu1 %v71_v5  ;;  %v50_v31 = vld [vmem:[#allocation2 + $0x38] sm:$0xff]  ;;  %v51_v33 = vld [vmem:[#allocation2 + $0x40] sm:$0xff] }
  0x28   :  { %312 = vmatprep.subr.mxu0 %v494_v0  ;;  %390 = vmatprep.subr.mxu1 %v494_v0  ;;  %v598_v34 = vld [vmem:[%s625_s2] ss:$0 sm:$0xff]  ;;  %s496_s2 = smov [#allocation7]  }
  0x29   :  { %313 = vmatpush3.msra.mxu0 %v70_v6  ;;  %406 = vmatpush3.msra.mxu1 %v70_v6  ;;  %s255_s24 = sshll.u32 %s496_s2, 4  ;;  %s256_s24 = int_to_ptr.vmem [resolvable:$true] %s255_s24 }
  0x2a   :  { %314 = vmatprep.subr.mxu0 %v494_v0  ;;  %391 = vmatprep.subr.mxu1 %v494_v0  ;;  %s464_s25 = scalar_lea.vmem %s256_s24, 2176  ;;  %p469_p11 = scmp.lt.s32.totalorder %s256_s24, %s256_s24 }
  0x2b   :  { %315 = vmatpush3.msra.mxu0 %v69_v7  ;;  %407 = vmatpush3.msra.mxu1 %v69_v7  ;;  %p465_p10 = scmp.ne.s32.totalorder %s256_s24, %s464_s25  ;;  %p470_p12 = scmp.lt.s32.totalorder %s464_s25, %s464_s25 }
  0x2c   :  { %316 = vmatprep.subr.mxu0 %v494_v0  ;;  %392 = vmatprep.subr.mxu1 %v494_v0 }
  0x2d   :  { %317 = vmatpush3.msra.mxu0 %v68_v8  ;;  %408 = vmatpush3.msra.mxu1 %v68_v8  ;;  %p471_p13 = por %p470_p12, %p469_p11 }
  0x2e   :  { %318 = vmatprep.subr.mxu0 %v494_v0  ;;  %393 = vmatprep.subr.mxu1 %v494_v0 }
  0x2f   :  { %319 = vmatpush3.msra.mxu0 %v67_v9  ;;  %409 = vmatpush3.msra.mxu1 %v67_v9  ;;  %p472_p0 = pnand %p471_p13, %p465_p10 }
  0x30   :  { %320 = vmatprep.subr.mxu0 %v494_v0  ;;  %394 = vmatprep.subr.mxu1 %v494_v0 }
  0x31   :  { %321 = vmatpush3.msra.mxu0 %v66_v10  ;;  %410 = vmatpush3.msra.mxu1 %v66_v10 }
  0x32   :  { %322 = vmatprep.subr.mxu0 %v494_v0  ;;  %395 = vmatprep.subr.mxu1 %v494_v0 }
  0x33   :  { %323 = vmatpush3.msra.mxu0 %v65_v11  ;;  %411 = vmatpush3.msra.mxu1 %v65_v11 }
  0x34   :  { %324 = vmatprep.subr.mxu0 %v494_v0  ;;  %396 = vmatprep.subr.mxu1 %v494_v0 }
  0x35   :  { %325 = vmatpush3.msra.mxu0 %v64_v12  ;;  %412 = vmatpush3.msra.mxu1 %v64_v12 }
  0x36   :  { %326 = vmatprep.subr.mxu0 %v494_v0  ;;  %397 = vmatprep.subr.mxu1 %v494_v0 }
  0x37   :  { %327 = vmatpush3.msra.mxu0 %v63_v13  ;;  %413 = vmatpush3.msra.mxu1 %v63_v13 }
  0x38   :  { %328 = vmatprep.subr.mxu0 %v494_v0  ;;  %398 = vmatprep.subr.mxu1 %v494_v0 }
  0x39   :  { %329 = vmatpush3.msra.mxu0 %v62_v14  ;;  %414 = vmatpush3.msra.mxu1 %v62_v14 }
  0x3a   :  { %330 = vmatprep.subr.mxu0 %v494_v0  ;;  %399 = vmatprep.subr.mxu1 %v494_v0 }
  0x3b   :  { %331 = vmatpush3.msra.mxu0 %v61_v15  ;;  %415 = vmatpush3.msra.mxu1 %v61_v15 }
  0x3c   :  { %332 = vmatprep.subr.mxu0 %v494_v0  ;;  %400 = vmatprep.subr.mxu1 %v494_v0 }
  0x3d   :  { %333 = vmatpush3.msra.mxu0 %v60_v16  ;;  %416 = vmatpush3.msra.mxu1 %v60_v16 }
  0x3e   :  { %335 = vmatmul.mubr.f32.vlgmr.msra.gmra.mxu0 %v43_v17  ;;  %362 = vmatmul.mubr.f32.vlgmr.msra.gmra.mxu1 %v52_v18 }
  0x3f   :  { %337 = vmatprep.mubr.msk.f32.mxu0 %vm495_vm0, %v494_v0  ;;  %364 = vmatprep.mubr.msk.f32.mxu1 %vm495_vm0, %v494_v0 }
  0x42   :  { %338 = vmatmul.mubr.f32.gmra.mxu0 %v44_v19  ;;  %365 = vmatmul.mubr.f32.gmra.mxu1 %v53_v20 }
  0x43   :  { %340 = vmatprep.mubr.msk.f32.mxu0 %vm495_vm0, %v494_v0  ;;  %367 = vmatprep.mubr.msk.f32.mxu1 %vm495_vm0, %v494_v0 }
  0x46   :  { %341 = vmatmul.mubr.f32.gmra.mxu0 %v45_v21  ;;  %368 = vmatmul.mubr.f32.gmra.mxu1 %v54_v22 }
  0x47   :  { %343 = vmatprep.mubr.msk.f32.mxu0 %vm495_vm0, %v494_v0  ;;  %370 = vmatprep.mubr.msk.f32.mxu1 %vm495_vm0, %v494_v0 }
  0x4a   :  { %344 = vmatmul.mubr.f32.gmra.mxu0 %v46_v23  ;;  %371 = vmatmul.mubr.f32.gmra.mxu1 %v55_v24 }
  0x4b   :  { %346 = vmatprep.mubr.msk.f32.mxu0 %vm495_vm0, %v494_v0  ;;  %373 = vmatprep.mubr.msk.f32.mxu1 %vm495_vm0, %v494_v0 }
  0x4e   :  { %347 = vmatmul.mubr.f32.gmra.mxu0 %v47_v25  ;;  %374 = vmatmul.mubr.f32.gmra.mxu1 %v56_v26 }
  0x4f   :  { %349 = vmatprep.mubr.msk.f32.mxu0 %vm495_vm0, %v494_v0  ;;  %376 = vmatprep.mubr.msk.f32.mxu1 %vm495_vm0, %v494_v0 }
  0x52   :  { %350 = vmatmul.mubr.f32.gmra.mxu0 %v48_v27  ;;  %377 = vmatmul.mubr.f32.gmra.mxu1 %v57_v28 }
  0x53   :  { %352 = vmatprep.mubr.msk.f32.mxu0 %vm495_vm0, %v494_v0  ;;  %379 = vmatprep.mubr.msk.f32.mxu1 %vm495_vm0, %v494_v0 }
  0x56   :  { %353 = vmatmul.mubr.f32.gmra.mxu0 %v49_v29  ;;  %380 = vmatmul.mubr.f32.gmra.mxu1 %v58_v30 }
  0x57   :  { %355 = vmatprep.mubr.msk.f32.mxu0 %vm495_vm0, %v494_v0  ;;  %382 = vmatprep.mubr.msk.f32.mxu1 %vm495_vm0, %v494_v0 }
  0x5a   :  { %356 = vmatmul.mubr.f32.gmra.mxu0 %v50_v31  ;;  %383 = vmatmul.mubr.f32.gmra.mxu1 %v59_v32 }
  0x5b   :  { %358 = vmatprep.mubr.msk.f32.mxu0 %vm495_vm0, %v494_v0 }
  0x5e   :  { %359 = vmatmul.mubr.f32.gmra.mxu0 %v51_v33 }
  0xfe   :  { %v149_v35 = vpop.f32.mrf.mxu0  ;;  %v194_v36 = vpop.f32.mrf.mxu1 }
  0xff   :  { %v150_v37 = vadd.f32 %v598_v34, %v149_v35  ;;  %v195_v38 = vadd.f32 %v598_v34, %v194_v36 }
 0x100   :  { %v336_v39 = vpop.f32.mrf.mxu0  ;;  %v363_v40 = vpop.f32.mrf.mxu1 }
 0x101   :  { %233 = vst [vmem:[#allocation7] sm:$0xff] %v150_v37  ;;  %242 = vst [vmem:[#allocation7 + $0x48] sm:$0xff] %v195_v38 }
 0x102   :  { %v154_v41 = vpop.f32.mrf.mxu0  ;;  %v199_v42 = vpop.f32.mrf.mxu1 }
 0x103   :  { %v155_v43 = vadd.f32 %v598_v34, %v154_v41  ;;  %v200_v44 = vadd.f32 %v598_v34, %v199_v42 }
 0x104   :  { %v339_v45 = vpop.f32.mrf.mxu0  ;;  %v366_v46 = vpop.f32.mrf.mxu1 }
 0x105   :  { %234 = vst [vmem:[#allocation7 + $0x8] sm:$0xff] %v155_v43  ;;  %243 = vst [vmem:[#allocation7 + $0x50] sm:$0xff] %v200_v44 }
 0x106   :  { %v159_v47 = vpop.f32.mrf.mxu0  ;;  %v204_v48 = vpop.f32.mrf.mxu1 }
 0x107   :  { %v160_v49 = vadd.f32 %v598_v34, %v159_v47  ;;  %v205_v50 = vadd.f32 %v598_v34, %v204_v48 }
 0x108   :  { %v342_v51 = vpop.f32.mrf.mxu0  ;;  %v369_v52 = vpop.f32.mrf.mxu1 }
 0x109   :  { %235 = vst [vmem:[#allocation7 + $0x10] sm:$0xff] %v160_v49  ;;  %244 = vst [vmem:[#allocation7 + $0x58] sm:$0xff] %v205_v50 }
 0x10a   :  { %v164_v53 = vpop.f32.mrf.mxu0  ;;  %v209_v54 = vpop.f32.mrf.mxu1 }
 0x10b   :  { %v165_v55 = vadd.f32 %v598_v34, %v164_v53  ;;  %v210_v56 = vadd.f32 %v598_v34, %v209_v54 }
 0x10c   :  { %v345_v57 = vpop.f32.mrf.mxu0  ;;  %v372_v58 = vpop.f32.mrf.mxu1 }
 0x10d   :  { %236 = vst [vmem:[#allocation7 + $0x18] sm:$0xff] %v165_v55  ;;  %245 = vst [vmem:[#allocation7 + $0x60] sm:$0xff] %v210_v56 }
 0x10e   :  { %v169_v59 = vpop.f32.mrf.mxu0  ;;  %v214_v60 = vpop.f32.mrf.mxu1 }
 0x10f   :  { %v170_v61 = vadd.f32 %v598_v34, %v169_v59  ;;  %v215_v62 = vadd.f32 %v598_v34, %v214_v60 }
 0x110   :  { %v348_v63 = vpop.f32.mrf.mxu0  ;;  %v375_v0 = vpop.f32.mrf.mxu1 }
 0x111   :  { %237 = vst [vmem:[#allocation7 + $0x20] sm:$0xff] %v170_v61  ;;  %246 = vst [vmem:[#allocation7 + $0x68] sm:$0xff] %v215_v62 }
 0x112   :  { %v174_v1 = vpop.f32.mrf.mxu0  ;;  %v219_v2 = vpop.f32.mrf.mxu1 }
 0x113   :  { %v175_v3 = vadd.f32 %v598_v34, %v174_v1  ;;  %v220_v4 = vadd.f32 %v598_v34, %v219_v2 }
 0x114   :  { %v351_v5 = vpop.f32.mrf.mxu0  ;;  %v378_v6 = vpop.f32.mrf.mxu1 }
 0x115   :  { %238 = vst [vmem:[#allocation7 + $0x28] sm:$0xff] %v175_v3  ;;  %247 = vst [vmem:[#allocation7 + $0x70] sm:$0xff] %v220_v4 }
 0x116   :  { %v179_v7 = vpop.f32.mrf.mxu0  ;;  %v224_v8 = vpop.f32.mrf.mxu1 }
 0x117   :  { %v180_v9 = vadd.f32 %v598_v34, %v179_v7  ;;  %v225_v10 = vadd.f32 %v598_v34, %v224_v8 }
 0x118   :  { %v354_v11 = vpop.f32.mrf.mxu0  ;;  %v381_v12 = vpop.f32.mrf.mxu1 }
 0x119   :  { %239 = vst [vmem:[#allocation7 + $0x30] sm:$0xff] %v180_v9  ;;  %248 = vst [vmem:[#allocation7 + $0x78] sm:$0xff] %v225_v10 }
 0x11a   :  { %v184_v13 = vpop.f32.mrf.mxu0  ;;  %v229_v14 = vpop.f32.mrf.mxu1 }
 0x11b   :  { %v185_v15 = vadd.f32 %v598_v34, %v184_v13  ;;  %v230_v16 = vadd.f32 %v598_v34, %v229_v14 }
 0x11c   :  { %v357_v17 = vpop.f32.mrf.mxu0  ;;  %v384_v18 = vpop.f32.mrf.mxu1 }
 0x11d   :  { %240 = vst [vmem:[#allocation7 + $0x38] sm:$0xff] %v185_v15  ;;  %249 = vst [vmem:[#allocation7 + $0x80] sm:$0x1] %v230_v16 }
 0x11e   :  { %v189_v19 = vpop.f32.mrf.mxu0 }
 0x11f   :  { %v190_v20 = vadd.f32 %v598_v34, %v189_v19 }
 0x120   :  { %v360_v21 = vpop.f32.mrf.mxu0 }
 0x121   :  { %241 = vst [vmem:[#allocation7 + $0x40] sm:$0xff] %v190_v20 }
 0x122   :  { %475 = shalt.err (!%p472_p0)
}
 0x123   :  { %261 = dma.vmem_to_hbm [thread:$0]  %s256_s24, 2176, %s626_s3, [#allocation4], %s491_s15, %s491_s15, %s492_s16  }
 0x124   :  { %488 = dma.done.wait [#allocation4], 2176  }
 0x125   :  { %489 = vsyncadd [#allocation4], 4294965120 }
 0x126   :  { %265 = vsyncpa [#allocation3], 1 }
 0x127   :  { %266 = vsyncpa [#allocation6], 1 }
 0x128   :  { %267 = vsyncpa [#allocation4], 1 }

</bundles_post_ra>
